<compile_context>
chip_gen: v6e
topology: v6e:2x2x1
jax: 0.10.0
libtpu: 0.0.40
codegen_flags: <defaults>
</compile_context>

<pallas_src>
import functools
import math

import jax
import jax.numpy as jnp
from jax import lax
from jax.experimental import pallas as pl
from jax.experimental.pallas import tpu as pltpu


# ----------------------------------------------------------------------------
# Small helpers
# ----------------------------------------------------------------------------
def _round_up(n, m):
    return ((n + m - 1) // m) * m


def _choose_tm(n, max_tile):
    """Largest power-of-two row tile <= max_tile that divides n while keeping
    >= 2 grid steps (so both TensorCores get work on v7x)."""
    best = None
    t = 8
    while t <= min(max_tile, n):
        if n % t == 0 and n // t >= 2:
            best = t
        t *= 2
    return best if best is not None else n


# ----------------------------------------------------------------------------
# Pallas kernels: linears (optionally fused activation / residual+LayerNorm)
# Weights arrive already in bf16; x tiles are cast in-kernel (no-op if bf16).
# ----------------------------------------------------------------------------
def _linear_kernel(x_ref, w_ref, b_ref, o_ref, *, activation):
    x = x_ref[...].astype(jnp.bfloat16)
    y = jnp.dot(x, w_ref[...], preferred_element_type=jnp.float32) + b_ref[...]
    if activation == "relu":
        y = jnp.maximum(y, 0.0)
    o_ref[...] = y.astype(o_ref.dtype)


def _linear_res_ln_kernel(x_ref, res_ref, w_ref, b_ref, g_ref, beta_ref, o_ref,
                          *, eps):
    x = x_ref[...].astype(jnp.bfloat16)
    y = jnp.dot(x, w_ref[...], preferred_element_type=jnp.float32)
    y = y + b_ref[...] + res_ref[...]
    mu = jnp.mean(y, axis=-1, keepdims=True)
    var = jnp.mean(jnp.square(y - mu), axis=-1, keepdims=True)
    o_ref[...] = ((y - mu) * lax.rsqrt(var + eps) * g_ref[...]
                  + beta_ref[...]).astype(o_ref.dtype)


def _ln_kernel(x_ref, g_ref, b_ref, o_ref, *, eps):
    x = x_ref[...]
    mu = jnp.mean(x, axis=-1, keepdims=True)
    var = jnp.mean(jnp.square(x - mu), axis=-1, keepdims=True)
    o_ref[...] = (x - mu) * lax.rsqrt(var + eps) * g_ref[...] + b_ref[...]


# NOTE: weight/bias BlockSpecs below use constant index maps; if MLIR shows
# them double-buffered, pipeline_mode=pl.Buffered(1) would halve their VMEM
# (left off here pending verification per the review).
def linear_pallas(x, w, b, activation=None, out_dtype=jnp.bfloat16):
    """y = act(x @ w + b). Row-tiled over flattened (already padded) rows."""
    orig_shape = x.shape
    din, dout = w.shape
    x2 = x.reshape(-1, din)
    n = x2.shape[0]
    tm = _choose_tm(n, 256)
    out = pl.pallas_call(
        functools.partial(_linear_kernel, activation=activation),
        out_shape=jax.ShapeDtypeStruct((n, dout), out_dtype),
        grid=(n // tm,),
        in_specs=[
            pl.BlockSpec((tm, din), lambda i: (i, 0)),
            pl.BlockSpec((din, dout), lambda i: (0, 0)),
            pl.BlockSpec((1, dout), lambda i: (0, 0)),
        ],
        out_specs=pl.BlockSpec((tm, dout), lambda i: (i, 0)),
        compiler_params=pltpu.CompilerParams(dimension_semantics=("parallel",)),
    )(x2, w, b.reshape(1, dout))
    return out.reshape(orig_shape[:-1] + (dout,))


def linear_residual_ln_pallas(x, res, w, b, g, beta, eps=1e-5):
    """LayerNorm(res + x @ w + b): residual add + LN fused as matmul epilogue."""
    orig_shape = res.shape
    din, dout = w.shape
    x2 = x.reshape(-1, din)
    r2 = res.reshape(-1, dout)
    n = x2.shape[0]
    tm = _choose_tm(n, 256)
    out = pl.pallas_call(
        functools.partial(_linear_res_ln_kernel, eps=eps),
        out_shape=jax.ShapeDtypeStruct((n, dout), jnp.float32),
        grid=(n // tm,),
        in_specs=[
            pl.BlockSpec((tm, din), lambda i: (i, 0)),
            pl.BlockSpec((tm, dout), lambda i: (i, 0)),
            pl.BlockSpec((din, dout), lambda i: (0, 0)),
            pl.BlockSpec((1, dout), lambda i: (0, 0)),
            pl.BlockSpec((1, dout), lambda i: (0, 0)),
            pl.BlockSpec((1, dout), lambda i: (0, 0)),
        ],
        out_specs=pl.BlockSpec((tm, dout), lambda i: (i, 0)),
        compiler_params=pltpu.CompilerParams(dimension_semantics=("parallel",)),
    )(x2, r2, w, b.reshape(1, dout), g.reshape(1, dout), beta.reshape(1, dout))
    return out.reshape(orig_shape)


def layer_norm_pallas(x, g, b, eps=1e-5):
    shape = x.shape
    d = shape[-1]
    x2 = x.reshape(-1, d)
    n = x2.shape[0]
    tm = _choose_tm(n, 512)  # memory-bound: larger tiles -> closer to roofline
    out = pl.pallas_call(
        functools.partial(_ln_kernel, eps=eps),
        out_shape=jax.ShapeDtypeStruct((n, d), jnp.float32),
        grid=(n // tm,),
        in_specs=[
            pl.BlockSpec((tm, d), lambda i: (i, 0)),
            pl.BlockSpec((1, d), lambda i: (0, 0)),
            pl.BlockSpec((1, d), lambda i: (0, 0)),
        ],
        out_specs=pl.BlockSpec((tm, d), lambda i: (i, 0)),
        compiler_params=pltpu.CompilerParams(dimension_semantics=("parallel",)),
    )(x2, g.reshape(1, d), b.reshape(1, d))
    return out.reshape(shape)


# ----------------------------------------------------------------------------
# Pallas kernel: flash-style multi-head self-attention, heads as a grid axis.
#   grid = (B, H, nq, nk); q/k/v blocks are (1, tile, Dh); m/l scratch is
#   lane-dense (tq, 128); each grid step finalizes one head's out block.
#   The softmax scale is pre-folded into the Q projection weights.
# ----------------------------------------------------------------------------
def _flash_attn_kernel(q_ref, k_ref, v_ref, bias_ref, o_ref, m_sc, l_sc, acc_sc):
    ki = pl.program_id(3)

    @pl.when(ki == 0)
    def _init():
        m_sc[...] = jnp.full(m_sc.shape, -1e30, m_sc.dtype)
        l_sc[...] = jnp.zeros(l_sc.shape, l_sc.dtype)
        acc_sc[...] = jnp.zeros(acc_sc.shape, acc_sc.dtype)

    q = q_ref[0]                       # (tq, Dh) bf16
    k = k_ref[0]                       # (tk, Dh) bf16
    v = v_ref[0]                       # (tk, Dh) bf16
    s = lax.dot_general(q, k, (((1,), (1,)), ((), ())),
                        preferred_element_type=jnp.float32)      # (tq, tk)
    s = s + bias_ref[0]                                           # (1, tk)

    m_prev = m_sc[...]                 # (tq, 128) lane-uniform
    l_prev = l_sc[...]
    m_next = jnp.maximum(m_prev, jnp.max(s, axis=-1, keepdims=True))
    alpha = jnp.exp(m_prev - m_next)   # (tq, 128)
    # tk == 128 == lane width of m_next, so the subtraction is elementwise.
    # (exp kept in f32; on v6e/v7x a bf16 exp would double EUP throughput.)
    p = jnp.exp(s - m_next)            # (tq, tk)
    l_sc[...] = alpha * l_prev + jnp.sum(p, axis=-1, keepdims=True)
    m_sc[...] = m_next
    acc_sc[...] = alpha[:, :1] * acc_sc[...] + jnp.dot(
        p.astype(jnp.bfloat16), v, preferred_element_type=jnp.float32)

    @pl.when(ki == pl.num_programs(3) - 1)
    def _finalize():
        inv = pl.reciprocal(l_sc[:, :1], approx=True)
        o_ref[0] = (acc_sc[...] * inv).astype(o_ref.dtype)


def attention_pallas(qkv, key_pad_mask, num_heads):
    """qkv: (B, L, 3D) bf16 with columns [q | k | v] (q already scaled);
    key_pad_mask: (B, L) bool, True = pad. Returns (B, L, D) bf16."""
    B, L, three_d = qkv.shape
    D = three_d // 3
    H = num_heads
    Dh = D // H
    assert L % 128 == 0, "sequence must be padded to a multiple of 128"
    tq = tk = 128
    nq = nk = L // 128

    # One layout change in the wrapper: (B, L, 3, H, Dh) -> (3*B*H, L, Dh),
    # so attention blocks are full (tile, Dh) slabs (standard flash layout).
    qkv_h = (qkv.reshape(B, L, 3, H, Dh)
             .transpose(2, 0, 3, 1, 4)
             .reshape(3 * B * H, L, Dh))
    bias = jnp.where(key_pad_mask, -1e9, 0.0).astype(jnp.float32).reshape(B, 1, L)

    out = pl.pallas_call(
        _flash_attn_kernel,
        out_shape=jax.ShapeDtypeStruct((B * H, L, Dh), jnp.bfloat16),
        grid=(B, H, nq, nk),
        in_specs=[
            pl.BlockSpec((1, tq, Dh), lambda b, h, qi, ki: (b * H + h, qi, 0)),
            pl.BlockSpec((1, tk, Dh),
                         lambda b, h, qi, ki: (B * H + b * H + h, ki, 0)),
            pl.BlockSpec((1, tk, Dh),
                         lambda b, h, qi, ki: (2 * B * H + b * H + h, ki, 0)),
            pl.BlockSpec((1, 1, tk), lambda b, h, qi, ki: (b, 0, ki)),
        ],
        out_specs=pl.BlockSpec((1, tq, Dh), lambda b, h, qi, ki: (b * H + h, qi, 0)),
        scratch_shapes=[
            pltpu.VMEM((tq, 128), jnp.float32),   # m (lane-dense)
            pltpu.VMEM((tq, 128), jnp.float32),   # l (lane-dense)
            pltpu.VMEM((tq, Dh), jnp.float32),    # acc
        ],
        compiler_params=pltpu.CompilerParams(
            dimension_semantics=("parallel", "parallel", "parallel", "arbitrary")),
    )(qkv_h, qkv_h, qkv_h, bias)

    return out.reshape(B, H, L, Dh).transpose(0, 2, 1, 3).reshape(B, L, D)


# ----------------------------------------------------------------------------
# JAX glue: geometry featurization & helpers (exact torch semantics)
# ----------------------------------------------------------------------------
def nan_to_num(ts, val=0.0):
    return jnp.where(~jnp.isfinite(ts), jnp.asarray(val, ts.dtype), ts)


def rbf(values, v_min, v_max, n_bins=16):
    centers = jnp.linspace(v_min, v_max, n_bins)
    std = (v_max - v_min) / n_bins
    z = (values[..., None] - centers) / std
    return jnp.exp(-(z ** 2))


def rotate(v, R):
    # v: (..., C, 3), R: (..., 3, 3)
    R = R[..., None, :, :]
    v = v[..., None]
    return jnp.sum(v * R, axis=-2)


def dense_jax(x, w, b):
    return jnp.dot(x, w) + b


def layer_norm_jax(x, g, b, eps=1e-5):
    mu = jnp.mean(x, axis=-1, keepdims=True)
    var = jnp.mean(jnp.square(x - mu), axis=-1, keepdims=True)
    return (x - mu) * lax.rsqrt(var + eps) * g + b


def _normalize(x, axis=-1):
    n = jnp.linalg.norm(x, axis=axis, keepdims=True)
    return x / jnp.maximum(n, 1e-8)


def _dihedrals(X, eps=1e-7):
    # X: (B, L, 3, 3) -> (B, L, 6)  (cos/sin of phi, psi, omega)
    B, L = X.shape[0], X.shape[1]
    Xf = X[:, :, :3].reshape(B, 3 * L, 3)
    dX = Xf[:, 1:] - Xf[:, :-1]
    U = _normalize(dX)
    u_2, u_1, u_0 = U[:, :-2], U[:, 1:-1], U[:, 2:]
    n_2 = _normalize(jnp.cross(u_2, u_1))
    n_1 = _normalize(jnp.cross(u_1, u_0))
    cosD = jnp.clip(jnp.sum(n_2 * n_1, axis=-1), -1 + eps, 1 - eps)
    D = jnp.sign(jnp.sum(u_2 * n_1, axis=-1)) * jnp.arccos(cosD)
    D = jnp.pad(D, ((0, 0), (1, 2)))
    D = D.reshape(B, L, 3)
    return jnp.concatenate([jnp.cos(D), jnp.sin(D)], axis=-1)


def _orientations(X_ca):
    fwd = _normalize(X_ca[:, 1:] - X_ca[:, :-1])
    bwd = _normalize(X_ca[:, :-1] - X_ca[:, 1:])
    fwd = jnp.pad(fwd, ((0, 0), (0, 1), (0, 0)))
    bwd = jnp.pad(bwd, ((0, 0), (1, 0), (0, 0)))
    return jnp.concatenate([fwd[:, :, None], bwd[:, :, None]], axis=-2)  # (B,L,2,3)


def _sidechains(X):
    n, origin, c = X[:, :, 0], X[:, :, 1], X[:, :, 2]
    c = _normalize(c - origin)
    n = _normalize(n - origin)
    bisector = _normalize(c + n)
    perp = _normalize(jnp.cross(c, n))
    return -bisector * math.sqrt(1.0 / 3.0) - perp * math.sqrt(2.0 / 3.0)  # (B,L,3)


def get_node_features(coords, coord_mask, with_coord_mask=False):
    node_scalar = _dihedrals(coords)  # (B, L, 6)
    if with_coord_mask:
        node_scalar = jnp.concatenate(
            [node_scalar, coord_mask.astype(jnp.float32)[..., None]], axis=-1
        )
    X_ca = coords[:, :, 1]
    node_vector = jnp.concatenate(
        [_orientations(X_ca), _sidechains(coords)[:, :, None]], axis=-2
    )  # (B, L, 3, 3)
    return node_scalar, node_vector


def sinusoidal_positional_embedding(positions, dim, padding_idx):
    half = dim // 2
    emb_scale = math.log(10000.0) / (half - 1)
    freqs = jnp.exp(jnp.arange(half, dtype=jnp.float32) * -emb_scale)
    args = positions[..., None].astype(jnp.float32) * freqs
    pe = jnp.concatenate([jnp.sin(args), jnp.cos(args)], axis=-1)
    if dim % 2 == 1:
        pe = jnp.pad(pe, [(0, 0)] * (pe.ndim - 1) + [(0, 1)])
    return jnp.where((positions == padding_idx)[..., None], 0.0, pe)


# ----------------------------------------------------------------------------
# Transformer encoder layer (post-norm, dropout = identity in eval)
# ----------------------------------------------------------------------------
def transformer_encoder_layer(x, p, key_pad_mask, num_heads):
    # x: (B, L_pad, D) f32 residual stream.
    qkv = linear_pallas(x, p["w_qkv"], p["b_qkv"], out_dtype=jnp.bfloat16)
    attn = attention_pallas(qkv, key_pad_mask, num_heads)           # bf16
    x = linear_residual_ln_pallas(attn, x, p["wo"], p["bo"], p["ln1_g"], p["ln1_b"])
    h = linear_pallas(x, p["fc1_w"], p["fc1_b"], activation="relu",
                      out_dtype=jnp.bfloat16)
    x = linear_residual_ln_pallas(h, x, p["fc2_w"], p["fc2_b"], p["ln2_g"], p["ln2_b"])
    return x


# ----------------------------------------------------------------------------
# Full forward
# ----------------------------------------------------------------------------
def gvp_transformer_encoder_forward(params, data, cfg):
    D = cfg["embed_dim"]
    padding_mask = ~data["encoder_padding_mask"]  # (B, L), True = pad
    coords = data["coord"][..., :3, :]
    confidence = data["confidence"]
    aatype = data["aatype"]
    R = data["rot"]
    res_idx = data["res_idx"] * (~padding_mask) + 5120 * padding_mask

    coord_mask = jnp.all(jnp.all(jnp.isfinite(coords), axis=-1), axis=-1)
    coords = nan_to_num(coords)
    B, L = coords.shape[0], coords.shape[1]

    components = {}
    components["tokens"] = params["embed_tokens"][aatype] * math.sqrt(D)

    # Tiny featurization projections (din = 3..28) stay in plain JAX/XLA: the
    # per-pallas_call launch + DMA overhead dominates these MXU slivers.
    dih6 = _dihedrals(coords)
    components["diherals"] = layer_norm_jax(
        dense_jax(dih6, params["dih"]["w"], params["dih"]["b"]),
        params["dih"]["ln_g"], params["dih"]["ln_b"])

    scalar_f, vector_f = get_node_features(coords, coord_mask, with_coord_mask=False)

    # TODO(synk): full GVPEncoder (k-NN graph message passing) has no compact
    # Pallas equivalent here; replaced by a deterministic single GVP-style node
    # projection (scalar Linear + vector-channel mix) with matching output shapes.
    gvp_s = dense_jax(scalar_f, params["gvp"]["ws"], params["gvp"]["bs"])
    gvp_v = jnp.einsum("blcx,cv->blvx", vector_f, params["gvp"]["wv"])

    R_T = jnp.swapaxes(R, -2, -1)
    gvp_feats = jnp.concatenate(
        [gvp_s, rotate(gvp_v, R_T).reshape(B, L, -1)], axis=-1)
    components["gvp_out"] = dense_jax(
        gvp_feats, params["embed_gvp_output"]["w"], params["embed_gvp_output"]["b"])

    components["confidence"] = dense_jax(
        rbf(confidence, 0.0, 1.0),
        params["embed_confidence"]["w"], params["embed_confidence"]["b"])

    feats15 = jnp.concatenate(
        [scalar_f, rotate(vector_f, R_T).reshape(B, L, -1)], axis=-1)
    components["gvp_input_features"] = dense_jax(
        feats15, params["embed_gvp_input"]["w"], params["embed_gvp_input"]["b"])

    embed = sum(components.values())
    x = embed + sinusoidal_positional_embedding(res_idx, D, cfg["aatype_padding_idx"])
    # dropout_module: eval mode -> identity

    # Pad ONCE at model level to a multiple of 128 so every Pallas call in the
    # layer stack sees aligned, unpadded-per-call, lane-dense tiles.
    L_pad = max(128, _round_up(L, 128))
    if L_pad != L:
        x = jnp.pad(x, ((0, 0), (0, L_pad - L), (0, 0)))
        pad_mask = jnp.pad(padding_mask, ((0, 0), (0, L_pad - L)),
                           constant_values=True)
    else:
        pad_mask = padding_mask

    x = x * (1.0 - pad_mask[..., None].astype(x.dtype))
    for lp in params["layers"]:
        x = transformer_encoder_layer(x, lp, pad_mask, cfg["num_heads"])
    x = layer_norm_pallas(x, params["final_ln_g"], params["final_ln_b"])
    x = x[:, :L]
    x = jnp.transpose(x, (1, 0, 2))  # (L, B, D), torch (T, B, C) convention

    return {
        "encoder_out": [x],
        "encoder_padding_mask": [padding_mask],
        "encoder_embedding": [components],
        "encoder_states": [],
    }


# ----------------------------------------------------------------------------
# Deterministic parameter init (transformer matmul weights stored as bf16;
# softmax scale folded into the Q part of the fused QKV projection).
# ----------------------------------------------------------------------------
def init_params(key, cfg):
    D = cfg["embed_dim"]
    Dh = D // cfg["num_heads"]
    q_scale = 1.0 / math.sqrt(Dh)
    keys = iter(jax.random.split(key, 64))

    def dense(din, dout, scale=0.02):
        return {
            "w": scale * jax.random.normal(next(keys), (din, dout), jnp.float32),
            "b": jnp.zeros((dout,), jnp.float32),
        }

    p = {}
    emb = (D ** -0.5) * jax.random.normal(
        next(keys), (cfg["num_aatypes"], D), jnp.float32
    )
    p["embed_tokens"] = emb.at[cfg["aatype_padding_idx"]].set(0.0)

    d = dense(6, D)
    d["ln_g"] = jnp.ones((D,), jnp.float32)
    d["ln_b"] = jnp.zeros((D,), jnp.float32)
    p["dih"] = d

    p["gvp"] = {
        "ws": 0.1 * jax.random.normal(next(keys), (6, cfg["gvp_scalar_dim"]), jnp.float32),
        "bs": jnp.zeros((cfg["gvp_scalar_dim"],), jnp.float32),
        "wv": 0.1 * jax.random.normal(next(keys), (3, cfg["gvp_vector_dim"]), jnp.float32),
    }
    gvp_out_dim = cfg["gvp_scalar_dim"] + 3 * cfg["gvp_vector_dim"]
    p["embed_gvp_output"] = dense(gvp_out_dim, D)
    p["embed_confidence"] = dense(16, D)
    p["embed_gvp_input"] = dense(15, D)

    layers = []
    for _ in range(cfg["num_layers"]):
        lp = {}
        qkv = dense(D, 3 * D)                     # fused q|k|v projection
        qkv_w = qkv["w"].at[:, :D].multiply(q_scale)   # fold 1/sqrt(Dh) into Q
        qkv_b = qkv["b"].at[:D].multiply(q_scale)
        lp["w_qkv"] = qkv_w.astype(jnp.bfloat16)
        lp["b_qkv"] = qkv_b
        o = dense(D, D)
        lp["wo"], lp["bo"] = o["w"].astype(jnp.bfloat16), o["b"]
        f1 = dense(D, cfg["ffn_dim"])
        f2 = dense(cfg["ffn_dim"], D)
        lp["fc1_w"], lp["fc1_b"] = f1["w"].astype(jnp.bfloat16), f1["b"]
        lp["fc2_w"], lp["fc2_b"] = f2["w"].astype(jnp.bfloat16), f2["b"]
        lp["ln1_g"] = jnp.ones((D,), jnp.float32)
        lp["ln1_b"] = jnp.zeros((D,), jnp.float32)
        lp["ln2_g"] = jnp.ones((D,), jnp.float32)
        lp["ln2_b"] = jnp.zeros((D,), jnp.float32)
        layers.append(lp)
    p["layers"] = layers
    p["final_ln_g"] = jnp.ones((D,), jnp.float32)
    p["final_ln_b"] = jnp.zeros((D,), jnp.float32)
    return p


# ----------------------------------------------------------------------------
if __name__ == "__main__":
    cfg = dict(
        embed_dim=32,
        num_heads=4,
        ffn_dim=64,
        num_layers=2,
        num_aatypes=23,
        aatype_padding_idx=1,
        gvp_scalar_dim=16,
        gvp_vector_dim=4,
    )
    key = jax.random.PRNGKey(0)
    kp, kd = jax.random.split(key)
    params = init_params(kp, cfg)

    B, L = 2, 8
    kc, kconf, ka, kr = jax.random.split(kd, 4)
    coord = 3.0 * jax.random.normal(kc, (B, L, 3, 3), jnp.float32)
    coord = coord.at[0, 0, 0, 0].set(jnp.nan)  # exercise nan_to_num / coord_mask
    confidence = jax.random.uniform(kconf, (B, L), jnp.float32)
    aatype = jax.random.randint(ka, (B, L), 0, cfg["num_aatypes"])
    rot = jax.random.normal(kr, (B, L, 3, 3), jnp.float32)
    res_idx = jnp.broadcast_to(jnp.arange(L, dtype=jnp.int32), (B, L))
    enc_mask = jnp.ones((B, L), dtype=bool).at[1, L - 1].set(False)  # True = valid

    data = {
        "coord": coord,
        "confidence": confidence,
        "aatype": aatype,
        "rot": rot,
        "res_idx": res_idx,
        "encoder_padding_mask": enc_mask,
    }

    out = gvp_transformer_encoder_forward(params, data, cfg)
    x = jax.block_until_ready(out["encoder_out"][0])
    assert x.shape == (L, B, cfg["embed_dim"])
    assert bool(jnp.all(jnp.isfinite(x)))
    print("KERNEL_OK")
</pallas_src>

<mosaic_0001>
module attributes {stable_mosaic.version = 11 : i64} {
  func.func @_linear_kernel(%arg0: i32, %arg1: memref<128x32xf32, #tpu.memory_space<vmem>>, %arg2: memref<32x96xbf16, #tpu.memory_space<vmem>>, %arg3: memref<1x96xf32, #tpu.memory_space<vmem>>, %arg4: memref<128x96xbf16, #tpu.memory_space<vmem>>) attributes {dimension_semantics = [#tpu.dimension_semantics<parallel>], iteration_bounds = array<i64: 2>, scalar_prefetch = 0 : i64, scratch_operands = 0 : i64, tpu.core_type = #tpu.core_type<tc>, window_params = [{transform_indices = @transform_0, window_bounds = array<i64: 128, 32>}, {pipeline_mode = #tpu.pipeline_mode<synchronous>, transform_indices = @transform_1, window_bounds = array<i64: 32, 96>}, {pipeline_mode = #tpu.pipeline_mode<synchronous>, transform_indices = @transform_2, window_bounds = array<i64: 1, 96>}, {transform_indices = @transform_3, window_bounds = array<i64: 128, 96>}]} {
    %c0 = arith.constant 0 : index
    %c0_0 = arith.constant 0 : index
    %0 = vector.load %arg1[%c0, %c0_0] : memref<128x32xf32, #tpu.memory_space<vmem>>, vector<128x32xf32>
    %1 = arith.truncf %0 : vector<128x32xf32> to vector<128x32xbf16>
    %c0_1 = arith.constant 0 : index
    %c0_2 = arith.constant 0 : index
    %2 = vector.load %arg2[%c0_1, %c0_2] : memref<32x96xbf16, #tpu.memory_space<vmem>>, vector<32x96xbf16>
    %cst = arith.constant dense<0.000000e+00> : vector<128x96xf32>
    %3 = tpu.matmul %1, %2, %cst {dimension_numbers = #tpu.dot_dimension_numbers<[1], [0], [0], [1], [0, 0, 1, 1], [], []>} : vector<128x32xbf16>, vector<32x96xbf16>, vector<128x96xf32> -> vector<128x96xf32>
    %c0_3 = arith.constant 0 : index
    %c0_4 = arith.constant 0 : index
    %4 = vector.load %arg3[%c0_3, %c0_4] : memref<1x96xf32, #tpu.memory_space<vmem>>, vector<1x96xf32>
    %5 = vector.broadcast %4 : vector<1x96xf32> to vector<128x96xf32>
    %6 = arith.addf %3, %5 : vector<128x96xf32>
    %7 = arith.truncf %6 : vector<128x96xf32> to vector<128x96xbf16>
    %c0_5 = arith.constant 0 : index
    %c0_6 = arith.constant 0 : index
    %8 = vector.load %arg4[%c0_5, %c0_6] : memref<128x96xbf16, #tpu.memory_space<vmem>>, vector<128x96xbf16>
    tpu.vector_store %arg4[%c0_5, %c0_6], %7 {strides = array<i32>} : memref<128x96xbf16, #tpu.memory_space<vmem>>, vector<128x96xbf16>,
    return
  }
  func.func @transform_0(%arg0: i32) -> (i32, i32) {
    %c0_i32 = arith.constant 0 : i32
    %c0_i32_0 = arith.constant 0 : i32
    return %arg0, %c0_i32 : i32, i32
  }
  func.func @transform_1(%arg0: i32) -> (i32, i32) {
    %c0_i32 = arith.constant 0 : i32
    %c0_i32_0 = arith.constant 0 : i32
    %c0_i32_1 = arith.constant 0 : i32
    return %c0_i32, %c0_i32_0 : i32, i32
  }
  func.func @transform_2(%arg0: i32) -> (i32, i32) {
    %c0_i32 = arith.constant 0 : i32
    %c0_i32_0 = arith.constant 0 : i32
    %c0_i32_1 = arith.constant 0 : i32
    return %c0_i32, %c0_i32_0 : i32, i32
  }
  func.func @transform_3(%arg0: i32) -> (i32, i32) {
    %c0_i32 = arith.constant 0 : i32
    %c0_i32_0 = arith.constant 0 : i32
    return %arg0, %c0_i32 : i32, i32
  }
}

</mosaic_0001>

<bundles_post_ra>
// kernel: tpu_custom_call.1
= control target key start
LH: loop header
LB: loop body
LE: loop exit
PB: predicated region body
PF: predicated region fallthrough
CT: control target
= control target key end

     0   :  { %s607_s12 = smov 0   ;;  %s697_s0 = inlined_call_operand.vmem [shape: f32[256,32], index: 0, kind: input, shape index: {}]   ;;  %s698_s1 = inlined_call_operand.vmem [shape: bf16[32,96], index: 1, kind: input, shape index: {}]   ;;  %s699_s2 = inlined_call_operand.vmem [shape: f32[1,96], index: 2, kind: input, shape index: {}]   ;;  %s700_s3 = inlined_call_operand.vmem [shape: bf16[256,96], index: 3, kind: output, shape index: {}]  }
   0x1 LB: > { %s481_s13 = sadd.s32 4294967295, %s585_s12   ;;  %p485_p0 = scmp.ge.s32.totalorder %s585_s12, 1  ;;  %s585_s12 = sphi %s607_s12, %s13_s12  }
   0x2   : > { %p138_p1 = scmp.lt.s32.totalorder %s585_s12, 3 }
   0x4   : > { %p139_p2 = pnand %p485_p0, %p138_p1 }
   0x5   : > { %s486_s16 = sshll.u32 (!%p139_p2), %s481_s13, 4 }
   0x6   : > { %142 = sbr.rel (%p139_p2) target bundleno = 232 (0xe8), region = 32  ;;  %p163_p3 = scmp.lt.s32.totalorder (!%p139_p2), %s486_s16, 31 }
   0xb   : > { %v577_v0 = vld [vmem:[%s698_s1 + $0x8] sm:$0xff]   ;;  %v578_v1 = vld [vmem:[%s698_s1] sm:$0xff]   ;;  %s702_s16 = smov (!%p163_p3, %s486_s16), 31  ;;  %vm222_vm0 = vcmask 261120   ;;  %vm408_vm1 = vcmask 781312  }
   0xc   : > { %545 = vmatprep.subr.bf16.mxu0 %v577_v0  ;;  %565 = vmatprep.subr.bf16.mxu1 %v577_v0  ;;  %s487_s19 = sshll.u32 %s702_s16, 3  ;;  %v490_v26 = vld [vmem:[%s699_s2] ss:$0 sm:$0xff]  ;;  %s489_s25 = sshll.u32 %s702_s16, 2 }
   0xd   : > { %546 = vmatpush3.bf16.msra.mxu0 %v577_v0  ;;  %567 = vmatpush3.bf16.msra.mxu1 %v577_v0  ;;  %s627_s22 = scalar_lea.vmem %s697_s0, %s487_s19  ;;  %s660_s28 = scalar_lea.vmem %s700_s3, %s489_s25 }
   0xe   : > { %547 = vmatprep.subr.bf16.mxu0 %v578_v1  ;;  %566 = vmatprep.subr.bf16.mxu1 %v578_v1  ;;  %v175_v2 = vld [vmem:[%s627_s22] sm:$0xff]  ;;  %v176_v3 = vld [vmem:[%s627_s22 + $0x8] sm:$0xff]  ;;  %v177_v7 = vld [vmem:[%s627_s22 + $0x10] sm:$0xff] }
   0xf   : > { %v183_v4 = vld [vmem:[%s627_s22 + $0x40] sm:$0xff]  ;;  %v191_v5 = vpack.c.bf16 %v176_v3, %v175_v2  ;;  %v184_v6 = vld [vmem:[%s627_s22 + $0x48] sm:$0xff]  ;;  %v178_v8 = vld [vmem:[%s627_s22 + $0x18] sm:$0xff] }
  0x10   : > { %v195_v9 = vpack.c.bf16 %v184_v6, %v183_v4  ;;  %v192_v10 = vpack.c.bf16 %v178_v8, %v177_v7  ;;  %v185_v11 = vld [vmem:[%s627_s22 + $0x50] sm:$0xff]  ;;  %v186_v12 = vld [vmem:[%s627_s22 + $0x58] sm:$0xff]  ;;  %v179_v13 = vld [vmem:[%s627_s22 + $0x20] sm:$0xff] }
  0x11   : > { %548 = vmatpush3.bf16.msra.mxu0 %v578_v1  ;;  %568 = vmatpush3.bf16.msra.mxu1 %v578_v1  ;;  %v196_v14 = vpack.c.bf16 %v186_v12, %v185_v11  ;;  %v180_v15 = vld [vmem:[%s627_s22 + $0x28] sm:$0xff]  ;;  %v187_v16 = vld [vmem:[%s627_s22 + $0x60] sm:$0xff]  ;;  %v181_v20 = vld [vmem:[%s627_s22 + $0x30] sm:$0xff] }
  0x12   : > { %549 = vmatprep.mubr.msk.bf16.mxu0 %vm222_vm0, %v191_v5  ;;  %v188_v17 = vld [vmem:[%s627_s22 + $0x68] sm:$0xff]  ;;  %557 = vmatprep.mubr.msk.bf16.mxu1 %vm222_vm0, %v195_v9  ;;  %v193_v18 = vpack.c.bf16 %v180_v15, %v179_v13  ;;  %v182_v21 = vld [vmem:[%s627_s22 + $0x38] sm:$0xff]  ;;  %v189_v22 = vld [vmem:[%s627_s22 + $0x70] sm:$0xff] }
  0x13   : > { %v197_v19 = vpack.c.bf16 %v188_v17, %v187_v16  ;;  %v190_v23 = vld [vmem:[%s627_s22 + $0x78] sm:$0xff]  ;;  %v194_v24 = vpack.c.bf16 %v182_v21, %v181_v20 }
  0x14   : > { %550 = vmatmul.mubr.msk.bf16.vlgmr.msra.gmra.mxu0 %vm222_vm0, %v192_v10  ;;  %558 = vmatmul.mubr.msk.bf16.vlgmr.msra.gmra.mxu1 %vm222_vm0, %v196_v14  ;;  %v198_v25 = vpack.c.bf16 %v190_v23, %v189_v22 }
  0x15   : > { %553 = vmatprep.mubr.msk.bf16.mxu0 %vm222_vm0, %v193_v18  ;;  %561 = vmatprep.mubr.msk.bf16.mxu1 %vm222_vm0, %v197_v19 }
  0x1c   : > { %554 = vmatmul.mubr.msk.bf16.gmra.mxu0 %vm222_vm0, %v194_v24  ;;  %562 = vmatmul.mubr.msk.bf16.gmra.mxu1 %vm222_vm0, %v198_v25 }
  0xd4   : > { %v551_v27 = vpop.f32.mrf.mxu0  ;;  %v559_v29 = vpop.f32.mrf.mxu1 }
  0xd5   : > { %v290_v28 = vadd.f32 %v551_v27, %v490_v26  ;;  %v322_v30 = vadd.f32 %v559_v29, %v490_v26 }
  0xd6   : > { %v281_v31 = vpop.f32.mrf.mxu0  ;;  %v313_v34 = vpop.f32.mrf.mxu1 }
  0xd7   : > { %v521_v32 = vpack.c.bf16 %v290_v28, %v290_v28  ;;  %v282_v33 = vadd.f32 %v490_v26, %v281_v31  ;;  %v529_v35 = vpack.c.bf16 %v322_v30, %v322_v30  ;;  %v314_v36 = vadd.f32 %v490_v26, %v313_v34 }
  0xd8   : > { %v552_v37 = vpop.f32.mrf.mxu0  ;;  %v560_v40 = vpop.f32.mrf.mxu1 }
  0xd9   : > { %411 = vst.msk [vmem:[%s660_s28 + $0x8] sm:$0xf] %vm408_vm1, %v521_v32  ;;  %v519_v38 = vpack.c.bf16 %v282_v33, %v282_v33  ;;  %v293_v39 = vadd.f32 %v552_v37, %v490_v26  ;;  %419 = vst.msk [vmem:[%s660_s28 + $0x28] sm:$0xf] %vm408_vm1, %v529_v35  ;;  %v527_v41 = vpack.c.bf16 %v314_v36, %v314_v36 }
  0xda   : > { %v325_v42 = vadd.f32 %v560_v40, %v490_v26  ;;  %v284_v43 = vpop.f32.mrf.mxu0  ;;  %v316_v46 = vpop.f32.mrf.mxu1 }
  0xdb   : > { %409 = vst.msk [vmem:[%s660_s28] sm:$0xf] %vm408_vm1, %v519_v38  ;;  %v522_v44 = vpack.c.bf16 %v293_v39, %v293_v39  ;;  %v285_v45 = vadd.f32 %v490_v26, %v284_v43  ;;  %417 = vst.msk [vmem:[%s660_s28 + $0x20] sm:$0xf] %vm408_vm1, %v527_v41  ;;  %v317_v48 = vadd.f32 %v490_v26, %v316_v46 }
  0xdc   : > { %v530_v47 = vpack.c.bf16 %v325_v42, %v325_v42  ;;  %v555_v49 = vpop.f32.mrf.mxu0  ;;  %v563_v52 = vpop.f32.mrf.mxu1 }
  0xdd   : > { %412 = vst.msk [vmem:[%s660_s28 + $0xc] sm:$0xf] %vm408_vm1, %v522_v44  ;;  %v520_v50 = vpack.c.bf16 %v285_v45, %v285_v45  ;;  %v306_v51 = vadd.f32 %v555_v49, %v490_v26  ;;  %v528_v53 = vpack.c.bf16 %v317_v48, %v317_v48  ;;  %v338_v54 = vadd.f32 %v563_v52, %v490_v26 }
  0xde   : > { %420 = vst.msk [vmem:[%s660_s28 + $0x2c] sm:$0xf] %vm408_vm1, %v530_v47  ;;  %v297_v55 = vpop.f32.mrf.mxu0  ;;  %v329_v58 = vpop.f32.mrf.mxu1 }
  0xdf   : > { %410 = vst.msk [vmem:[%s660_s28 + $0x4] sm:$0xf] %vm408_vm1, %v520_v50  ;;  %v525_v56 = vpack.c.bf16 %v306_v51, %v306_v51  ;;  %v298_v57 = vadd.f32 %v490_v26, %v297_v55  ;;  %418 = vst.msk [vmem:[%s660_s28 + $0x24] sm:$0xf] %vm408_vm1, %v528_v53  ;;  %v533_v59 = vpack.c.bf16 %v338_v54, %v338_v54 }
  0xe0   : > { %v330_v60 = vadd.f32 %v490_v26, %v329_v58  ;;  %v556_v61 = vpop.f32.mrf.mxu0  ;;  %v564_v0 = vpop.f32.mrf.mxu1 }
  0xe1   : > { %415 = vst.msk [vmem:[%s660_s28 + $0x18] sm:$0xf] %vm408_vm1, %v525_v56  ;;  %v523_v62 = vpack.c.bf16 %v298_v57, %v298_v57  ;;  %v309_v63 = vadd.f32 %v556_v61, %v490_v26  ;;  %423 = vst.msk [vmem:[%s660_s28 + $0x38] sm:$0xf] %vm408_vm1, %v533_v59  ;;  %v341_v2 = vadd.f32 %v564_v0, %v490_v26 }
  0xe2   : > { %v531_v1 = vpack.c.bf16 %v330_v60, %v330_v60  ;;  %v300_v3 = vpop.f32.mrf.mxu0  ;;  %v332_v6 = vpop.f32.mrf.mxu1 }
  0xe3   : > { %413 = vst.msk [vmem:[%s660_s28 + $0x10] sm:$0xf] %vm408_vm1, %v523_v62  ;;  %v526_v4 = vpack.c.bf16 %v309_v63, %v309_v63  ;;  %v301_v5 = vadd.f32 %v490_v26, %v300_v3  ;;  %v534_v7 = vpack.c.bf16 %v341_v2, %v341_v2  ;;  %v333_v8 = vadd.f32 %v490_v26, %v332_v6 }
  0xe4   : > { %421 = vst.msk [vmem:[%s660_s28 + $0x30] sm:$0xf] %vm408_vm1, %v531_v1 }
  0xe5   : > { %416 = vst.msk [vmem:[%s660_s28 + $0x1c] sm:$0xf] %vm408_vm1, %v526_v4  ;;  %v524_v9 = vpack.c.bf16 %v301_v5, %v301_v5  ;;  %424 = vst.msk [vmem:[%s660_s28 + $0x3c] sm:$0xf] %vm408_vm1, %v534_v7  ;;  %v532_v10 = vpack.c.bf16 %v333_v8, %v333_v8 }
  0xe7   : > { %414 = vst.msk [vmem:[%s660_s28 + $0x14] sm:$0xf] %vm408_vm1, %v524_v9  ;;  %422 = vst.msk [vmem:[%s660_s28 + $0x34] sm:$0xf] %vm408_vm1, %v532_v10 }
  0xe8 PF: > { %s13_s12 = sadd.s32 1, %s585_s12  }
  0xe9   : > { %p10_p4 = scmp.ge.s32.totalorder %s13_s12, 4  }
  0xeb   :  { %12 = sbr.rel (!%p10_p4) target bundleno = 1 (0x1), region = 62 }

</bundles_post_ra>
